<compile_context>
chip_gen: v7x
topology: tpu7x:2x2x1
jax: 0.10.0
libtpu: 0.0.40
codegen_flags: <defaults>
</compile_context>

<pallas_src>
import functools

import jax
import jax.numpy as jnp
from jax import lax
from jax.experimental import pallas as pl
from jax.experimental.pallas import tpu as pltpu

SEQ_LEN = 2          # seqs_length
BATCH = 2            # batch_size
FEATURE = 16         # model_feature_size
HIDDEN = 32          # model_hidden_size


def lstm_kernel(x_ref, wih_ref, whh_ref, b_ref, out_ref, xp_scr, *,
                seq_len, batch_pad, hidden):
    """Whole-sequence LSTM recurrence in a single kernel invocation.

    x_ref   : (S*Bp, F)    f32   time-major inputs, batch padded to Bp, flattened over (S, Bp)
    wih_ref : (F, 4H)      f32   W_ih^T
    whh_ref : (4H, 4H)     bf16  W_hh^T padded with zero rows [H:4H] (lane-dense K)
    b_ref   : (1, 4H)      f32   b_ih + b_hh
    out_ref : (S*Bp, 4H)   f32   hidden-state sequence, h in lanes [0:H], zeros in [H:4H]
    xp_scr  : (S*Bp, 4H)   f32   VMEM scratch: x @ W_ih^T + b for all time steps
    """
    S, Bp, H = seq_len, batch_pad, hidden
    G = 4 * H  # 128 gate lanes == one full lane tile for HIDDEN=32

    # ---- hoisted out of the recurrence (runs once) --------------------------------------
    # Input projection for ALL time steps in one MXU matmul; bias folded in once.
    xp_scr[...] = (
        jnp.dot(x_ref[...], wih_ref[...], preferred_element_type=jnp.float32)
        + b_ref[...]
    )

    whh = whh_ref[...]  # (G, G) bf16, resident for the whole loop

    # Per-lane constants for the single-tanh gate activation:
    #   sigmoid(x) = 0.5 * tanh(0.5 * x) + 0.5   (i, f, o lanes)
    #   tanh(x)    = 1.0 * tanh(1.0 * x) + 0.0   (g lanes)
    lane = lax.broadcasted_iota(jnp.int32, (Bp, G), 1)
    is_g = (lane >= 2 * H) & (lane < 3 * H)
    scale = jnp.where(is_g, 1.0, 0.5).astype(jnp.float32)   # pre-scale == post-mul
    shift = jnp.where(is_g, 0.0, 0.5).astype(jnp.float32)
    lane_pad = jnp.zeros((Bp, G - H), jnp.float32)           # zero lanes [H:G] of the h slab

    def step(t, carry):
        h, c = carry                                   # h: (Bp, G) f32 padded; c: (Bp, H) f32
        row = pl.multiple_of(t * Bp, Bp)               # sublane-aligned dynamic offset

        # Recurrent projection: (Bp, G) x (G, G) bf16 operands, f32 accumulation.
        gates = xp_scr[pl.ds(row, Bp), :] + jnp.dot(
            h.astype(jnp.bfloat16), whh, preferred_element_type=jnp.float32
        )  # (Bp, G), gate order i, f, g, o (PyTorch convention)

        # Single EUP push over the full 128-lane vreg; sigmoid recovered with VPU mul/add.
        act = jnp.tanh(gates * scale) * scale + shift
        i_g = act[:, 0 * H:1 * H]
        f_g = act[:, 1 * H:2 * H]
        g_g = act[:, 2 * H:3 * H]
        o_g = act[:, 3 * H:4 * H]

        c_new = f_g * c + i_g * g_g                    # f32 state update (VPU)
        h_core = o_g * jnp.tanh(c_new)                 # (Bp, H) f32
        h_new = jnp.concatenate([h_core, lane_pad], axis=1)   # (Bp, G) lane-dense slab

        # Full-width, tile-aligned, unmasked store.
        out_ref[pl.ds(row, Bp), :] = h_new
        return (h_new, c_new)

    h0 = jnp.zeros((Bp, G), jnp.float32)
    c0 = jnp.zeros((Bp, H), jnp.float32)
    # SEQ_LEN is tiny; cap the unroll (e.g. unroll=4) if it ever grows large.
    lax.fori_loop(0, S, step, (h0, c0), unroll=True)


def prepare_lstm_params(w_ih, w_hh, b_ih, b_hh):
    """One-time parameter massaging (kept out of the per-call path)."""
    H = w_hh.shape[1]
    wih_t = jnp.asarray(w_ih.T, jnp.float32)                            # (F, 4H)
    whh_pad = jnp.pad(jnp.asarray(w_hh.T, jnp.bfloat16), ((0, 3 * H), (0, 0)))  # (4H, 4H)
    bias = jnp.asarray((b_ih + b_hh).reshape(1, 4 * H), jnp.float32)    # (1, 4H)
    return wih_t, whh_pad, bias


@jax.jit
def lstm_forward(x, wih_t, whh_pad, bias):
    """x: (S, B, F); prepared params from prepare_lstm_params.

    Returns out: (S, B, H) f32 -- the full hidden-state sequence (LSTM_Model.forward output).
    """
    S, B, F = x.shape
    G = whh_pad.shape[1]
    H = G // 4
    Bp = ((B + 7) // 8) * 8  # pad batch to a full f32 sublane tile -> unmasked tiles/stores

    # Single pad op; flatten (S, Bp) so the hoisted input projection is one matmul.
    x_flat = jnp.pad(x, ((0, 0), (0, Bp - B), (0, 0))).reshape(S * Bp, F)

    kernel = functools.partial(lstm_kernel, seq_len=S, batch_pad=Bp, hidden=H)

    out_flat = pl.pallas_call(
        kernel,
        out_shape=jax.ShapeDtypeStruct((S * Bp, G), jnp.float32),
        in_specs=[
            pl.BlockSpec(memory_space=pltpu.MemorySpace.VMEM),  # x_flat
            pl.BlockSpec(memory_space=pltpu.MemorySpace.VMEM),  # W_ih^T
            pl.BlockSpec(memory_space=pltpu.MemorySpace.VMEM),  # W_hh^T (padded)
            pl.BlockSpec(memory_space=pltpu.MemorySpace.VMEM),  # bias
        ],
        out_specs=pl.BlockSpec(memory_space=pltpu.MemorySpace.VMEM),
        scratch_shapes=[
            pltpu.VMEM((S * Bp, G), jnp.float32),  # hoisted x-projection (+bias)
        ],
    )(x_flat, wih_t, whh_pad, bias)

    # Lanes [H:G] are zero padding; batch rows [B:Bp] are pad rows.
    return out_flat.reshape(S, Bp, G)[:, :B, :H]


def lstm_reference(x, w_ih, w_hh, b_ih, b_hh):
    """Pure-JAX f32 reference of the same recurrence (for a correctness check)."""
    S, B, F = x.shape
    H = w_hh.shape[1]
    h = jnp.zeros((B, H), jnp.float32)
    c = jnp.zeros((B, H), jnp.float32)

    def step(carry, x_t):
        h, c = carry
        gates = x_t @ w_ih.T + h @ w_hh.T + b_ih + b_hh
        i = jax.nn.sigmoid(gates[:, 0 * H:1 * H])
        f = jax.nn.sigmoid(gates[:, 1 * H:2 * H])
        g = jnp.tanh(gates[:, 2 * H:3 * H])
        o = jax.nn.sigmoid(gates[:, 3 * H:4 * H])
        c = f * c + i * g
        h = o * jnp.tanh(c)
        return (h, c), h

    (_, _), out = jax.lax.scan(step, (h, c), x.astype(jnp.float32))
    return out


if __name__ == "__main__":
    key = jax.random.PRNGKey(0)
    k_x, k_wih, k_whh, k_bih, k_bhh = jax.random.split(key, 5)

    # Deterministic parameter init (PyTorch nn.LSTM default: U(-1/sqrt(H), 1/sqrt(H)))
    bound = 1.0 / (HIDDEN ** 0.5)
    w_ih = jax.random.uniform(k_wih, (4 * HIDDEN, FEATURE), jnp.float32, -bound, bound)
    w_hh = jax.random.uniform(k_whh, (4 * HIDDEN, HIDDEN), jnp.float32, -bound, bound)
    b_ih = jax.random.uniform(k_bih, (4 * HIDDEN,), jnp.float32, -bound, bound)
    b_hh = jax.random.uniform(k_bhh, (4 * HIDDEN,), jnp.float32, -bound, bound)

    # Dummy input, time-major: (seq_len, batch, feature)
    x = jax.random.uniform(k_x, (SEQ_LEN, BATCH, FEATURE), jnp.float32)

    params = prepare_lstm_params(w_ih, w_hh, b_ih, b_hh)
    out = jax.block_until_ready(lstm_forward(x, *params))

    ref = lstm_reference(x, w_ih, w_hh, b_ih, b_hh)
    assert out.shape == (SEQ_LEN, BATCH, HIDDEN)
    # bf16 recurrent-matmul operands with f32 accumulation -> bf16-level tolerance vs f32 ref.
    assert jnp.allclose(out, ref, atol=2e-2, rtol=2e-2), "Pallas LSTM mismatch vs reference"

    print("KERNEL_OK")
</pallas_src>

<mosaic_0001>
module attributes {stable_mosaic.version = 11 : i64} {
  func.func @lstm_kernel(%arg0: memref<16x16xf32, #tpu.memory_space<vmem>>, %arg1: memref<16x128xf32, #tpu.memory_space<vmem>>, %arg2: memref<128x128xbf16, #tpu.memory_space<vmem>>, %arg3: memref<1x128xf32, #tpu.memory_space<vmem>>, %arg4: memref<16x128xf32, #tpu.memory_space<vmem>>, %arg5: memref<16x128xf32, #tpu.memory_space<vmem>>) attributes {dimension_semantics = [], scalar_prefetch = 0 : i64, scratch_operands = 1 : i64, tpu.core_type = #tpu.core_type<tc>} {
    %c0 = arith.constant 0 : index
    %c0_0 = arith.constant 0 : index
    %0 = vector.load %arg0[%c0, %c0_0] : memref<16x16xf32, #tpu.memory_space<vmem>>, vector<16x16xf32>
    %c0_1 = arith.constant 0 : index
    %c0_2 = arith.constant 0 : index
    %1 = vector.load %arg1[%c0_1, %c0_2] : memref<16x128xf32, #tpu.memory_space<vmem>>, vector<16x128xf32>
    %cst = arith.constant dense<0.000000e+00> : vector<16x128xf32>
    %2 = tpu.matmul %0, %1, %cst {dimension_numbers = #tpu.dot_dimension_numbers<[1], [0], [0], [1], [0, 0, 1, 1], [], []>} : vector<16x16xf32>, vector<16x128xf32>, vector<16x128xf32> -> vector<16x128xf32>
    %c0_3 = arith.constant 0 : index
    %c0_4 = arith.constant 0 : index
    %3 = vector.load %arg3[%c0_3, %c0_4] : memref<1x128xf32, #tpu.memory_space<vmem>>, vector<1x128xf32>
    %4 = vector.broadcast %3 : vector<1x128xf32> to vector<16x128xf32>
    %5 = arith.addf %2, %4 : vector<16x128xf32>
    %c0_5 = arith.constant 0 : index
    %c0_6 = arith.constant 0 : index
    %6 = vector.load %arg5[%c0_5, %c0_6] : memref<16x128xf32, #tpu.memory_space<vmem>>, vector<16x128xf32>
    tpu.vector_store %arg5[%c0_5, %c0_6], %5 {strides = array<i32>} : memref<16x128xf32, #tpu.memory_space<vmem>>, vector<16x128xf32>,
    %c0_7 = arith.constant 0 : index
    %c0_8 = arith.constant 0 : index
    %7 = vector.load %arg2[%c0_7, %c0_8] : memref<128x128xbf16, #tpu.memory_space<vmem>>, vector<128x128xbf16>
    %8 = tpu.iota {dimensions = array<i32: 1>} : vector<8x128xi32>
    %c64_i32 = arith.constant 64 : i32
    %9 = vector.broadcast %c64_i32 : i32 to vector<8x128xi32>
    %10 = arith.cmpi sge, %8, %9 : vector<8x128xi32>
    %c96_i32 = arith.constant 96 : i32
    %11 = vector.broadcast %c96_i32 : i32 to vector<8x128xi32>
    %12 = arith.cmpi slt, %8, %11 : vector<8x128xi32>
    %13 = arith.andi %10, %12 : vector<8x128xi1>
    %cst_9 = arith.constant 1.000000e+00 : f32
    %cst_10 = arith.constant 5.000000e-01 : f32
    %14 = vector.broadcast %cst_9 : f32 to vector<8x128xf32>
    %15 = vector.broadcast %cst_10 : f32 to vector<8x128xf32>
    %16 = arith.select %13, %14, %15 : vector<8x128xi1>, vector<8x128xf32>
    %cst_11 = arith.constant 0.000000e+00 : f32
    %cst_12 = arith.constant 5.000000e-01 : f32
    %17 = vector.broadcast %cst_11 : f32 to vector<8x128xf32>
    %18 = vector.broadcast %cst_12 : f32 to vector<8x128xf32>
    %19 = arith.select %13, %17, %18 : vector<8x128xi1>, vector<8x128xf32>
    %cst_13 = arith.constant 0.000000e+00 : f32
    %20 = vector.broadcast %cst_13 : f32 to vector<8x96xf32>
    %cst_14 = arith.constant 0.000000e+00 : f32
    %21 = vector.broadcast %cst_14 : f32 to vector<8x128xf32>
    %cst_15 = arith.constant 0.000000e+00 : f32
    %22 = vector.broadcast %cst_15 : f32 to vector<8x32xf32>
    %c0_i32 = arith.constant 0 : i32
    %c8_i32 = arith.constant 8 : i32
    %23 = arith.muli %c0_i32, %c8_i32 : i32
    %24 = tpu.assume_multiple %23, 8 : i32
    %25 = arith.index_cast %24 : i32 to index
    %c0_16 = arith.constant 0 : index
    %26 = vector.load %arg5[%25, %c0_16] : memref<16x128xf32, #tpu.memory_space<vmem>>, vector<8x128xf32>
    %27 = arith.truncf %21 : vector<8x128xf32> to vector<8x128xbf16>
    %cst_17 = arith.constant dense<0.000000e+00> : vector<8x128xf32>
    %28 = tpu.matmul %27, %7, %cst_17 {dimension_numbers = #tpu.dot_dimension_numbers<[1], [0], [0], [1], [0, 0, 1, 1], [], []>} : vector<8x128xbf16>, vector<128x128xbf16>, vector<8x128xf32> -> vector<8x128xf32>
    %29 = arith.addf %26, %28 : vector<8x128xf32>
    %30 = arith.mulf %29, %16 : vector<8x128xf32>
    %31 = math.tanh %30 : vector<8x128xf32>
    %32 = arith.mulf %31, %16 : vector<8x128xf32>
    %33 = arith.addf %32, %19 : vector<8x128xf32>
    %34 = vector.extract_strided_slice %33 {offsets = [0, 0], sizes = [8, 32], strides = [1, 1]} : vector<8x128xf32> to vector<8x32xf32>
    %35 = vector.extract_strided_slice %33 {offsets = [0, 32], sizes = [8, 32], strides = [1, 1]} : vector<8x128xf32> to vector<8x32xf32>
    %36 = vector.extract_strided_slice %33 {offsets = [0, 64], sizes = [8, 32], strides = [1, 1]} : vector<8x128xf32> to vector<8x32xf32>
    %37 = vector.extract_strided_slice %33 {offsets = [0, 96], sizes = [8, 32], strides = [1, 1]} : vector<8x128xf32> to vector<8x32xf32>
    %38 = arith.mulf %35, %22 : vector<8x32xf32>
    %39 = arith.mulf %34, %36 : vector<8x32xf32>
    %40 = arith.addf %38, %39 : vector<8x32xf32>
    %41 = math.tanh %40 : vector<8x32xf32>
    %42 = arith.mulf %37, %41 : vector<8x32xf32>
    %43 = tpu.concatenate %42, %20 in 1 : vector<8x32xf32>, vector<8x96xf32> -> vector<8x128xf32>
    %44 = arith.index_cast %24 : i32 to index
    %c0_18 = arith.constant 0 : index
    %45 = vector.load %arg4[%44, %c0_18] : memref<16x128xf32, #tpu.memory_space<vmem>>, vector<8x128xf32>
    tpu.vector_store %arg4[%44, %c0_18], %43 {strides = array<i32>} : memref<16x128xf32, #tpu.memory_space<vmem>>, vector<8x128xf32>,
    %c1_i32 = arith.constant 1 : i32
    %c8_i32_19 = arith.constant 8 : i32
    %46 = arith.muli %c1_i32, %c8_i32_19 : i32
    %47 = tpu.assume_multiple %46, 8 : i32
    %48 = arith.index_cast %47 : i32 to index
    %c0_20 = arith.constant 0 : index
    %49 = vector.load %arg5[%48, %c0_20] : memref<16x128xf32, #tpu.memory_space<vmem>>, vector<8x128xf32>
    %50 = arith.truncf %43 : vector<8x128xf32> to vector<8x128xbf16>
    %cst_21 = arith.constant dense<0.000000e+00> : vector<8x128xf32>
    %51 = tpu.matmul %50, %7, %cst_21 {dimension_numbers = #tpu.dot_dimension_numbers<[1], [0], [0], [1], [0, 0, 1, 1], [], []>} : vector<8x128xbf16>, vector<128x128xbf16>, vector<8x128xf32> -> vector<8x128xf32>
    %52 = arith.addf %49, %51 : vector<8x128xf32>
    %53 = arith.mulf %52, %16 : vector<8x128xf32>
    %54 = math.tanh %53 : vector<8x128xf32>
    %55 = arith.mulf %54, %16 : vector<8x128xf32>
    %56 = arith.addf %55, %19 : vector<8x128xf32>
    %57 = vector.extract_strided_slice %56 {offsets = [0, 0], sizes = [8, 32], strides = [1, 1]} : vector<8x128xf32> to vector<8x32xf32>
    %58 = vector.extract_strided_slice %56 {offsets = [0, 32], sizes = [8, 32], strides = [1, 1]} : vector<8x128xf32> to vector<8x32xf32>
    %59 = vector.extract_strided_slice %56 {offsets = [0, 64], sizes = [8, 32], strides = [1, 1]} : vector<8x128xf32> to vector<8x32xf32>
    %60 = vector.extract_strided_slice %56 {offsets = [0, 96], sizes = [8, 32], strides = [1, 1]} : vector<8x128xf32> to vector<8x32xf32>
    %61 = arith.mulf %58, %40 : vector<8x32xf32>
    %62 = arith.mulf %57, %59 : vector<8x32xf32>
    %63 = arith.addf %61, %62 : vector<8x32xf32>
    %64 = math.tanh %63 : vector<8x32xf32>
    %65 = arith.mulf %60, %64 : vector<8x32xf32>
    %66 = tpu.concatenate %65, %20 in 1 : vector<8x32xf32>, vector<8x96xf32> -> vector<8x128xf32>
    %67 = arith.index_cast %47 : i32 to index
    %c0_22 = arith.constant 0 : index
    %68 = vector.load %arg4[%67, %c0_22] : memref<16x128xf32, #tpu.memory_space<vmem>>, vector<8x128xf32>
    tpu.vector_store %arg4[%67, %c0_22], %66 {strides = array<i32>} : memref<16x128xf32, #tpu.memory_space<vmem>>, vector<8x128xf32>,
    %c2_i32 = arith.constant 2 : i32
    return
  }
}

</mosaic_0001>

<bundles_post_ra>
// kernel: lstm_forward.1
= control target key start
LH: loop header
LB: loop body
LE: loop exit
PB: predicated region body
PF: predicated region fallthrough
CT: control target
= control target key end

     0   :  { %9 = vsyncpa [#allocation4], 0  ;;  %s481_s15 = smov [#allocation3]   ;;  %s563_s0 = inlined_call_operand.vmem [shape: f32[16,16], index: 0, kind: input, shape index: {}]   ;;  %s564_s1 = inlined_call_operand.vmem [shape: f32[16,128], index: 1, kind: input, shape index: {}]   ;;  %s565_s2 = inlined_call_operand.hbm [shape: bf16[128,128], index: 2, kind: input, shape index: {}]   ;;  %s566_s3 = inlined_call_operand.vmem [shape: f32[1,128], index: 3, kind: input, shape index: {}]   ;;  %s567_s4 = inlined_call_operand.vmem [shape: f32[16,128], index: 4, kind: output, shape index: {}]  }
   0x1   :  { %s19_s16 = sshll.u32 %s481_s15, 4  ;;  %s457_s19 = scalar_lea.hbm %s565_s2, 1024  ;;  %s20_s16 = int_to_ptr.vmem [resolvable:$true] %s19_s16 }
   0x2   :  { %p458_p0 = scmp.ne.s32.totalorder %s565_s2, %s457_s19  ;;  %p461_p1 = scmp.lt.u32.totalorder %s457_s19, %s565_s2 }
   0x4   :  { %p463_p2 = pnand %p461_p1, %p458_p0 }
   0x6   :  { %466 = shalt.err (!%p463_p2)
}
   0x7   :  { %s467_s24 = scalar_lea.vmem %s20_s16, 1024  ;;  %p472_p4 = scmp.lt.s32.totalorder %s20_s16, %s20_s16 }
   0x8   :  { %p468_p3 = scmp.ne.s32.totalorder %s20_s16, %s467_s24  ;;  %p473_p5 = scmp.lt.s32.totalorder %s467_s24, %s467_s24 }
   0xa   :  { %p474_p6 = por %p473_p5, %p472_p4 }
   0xc   :  { %p475_p7 = pnand %p474_p6, %p468_p3 }
   0xe   :  { %478 = shalt.err (!%p475_p7)
}
   0xf   :  { %s482_s25 = smov 64   ;;  %s483_s26 = smov 4  }
  0x10   :  { %25 = dma.hbm_to_vmem [thread:$0]  %s565_s2, 1024, %s20_s16, [#allocation4], %s482_s25, %s482_s25, %s483_s26  }
  0x11   :  { %479 = dma.done.wait [#allocation4], 1024  }
  0x12   :  { %480 = vsyncadd [#allocation4], 4294966272  ;;  %v484_v0 = vmov 0.0   ;;  %vm485_vm0 = vmmov 0   ;;  %v441_v1 = vld [vmem:[#allocation3] sm:$0xff]   ;;  %v442_v2 = vld [vmem:[#allocation3 + $0x8] sm:$0xff]   ;;  %v143_v19 = vlaneseq }
  0x13   :  { %389 = vmatprep.subr.bf16.mxu1 %v484_v0  ;;  %405 = vmatprep.mubr.msk.bf16.mxu1 %vm485_vm0, %v484_v0  ;;  %v443_v3 = vld [vmem:[#allocation3 + $0x10] sm:$0xff]   ;;  %vm43_vm1 = vcmask 130048   ;;  %v34_v4 = vld [vmem:[%s564_s1] sm:$0xff]  ;;  %v35_v5 = vld [vmem:[%s564_s1 + $0x8] sm:$0xff]  ;;  %v486_v14 = vmov 0   ;;  %v487_v22 = vmov 0.5  }
  0x14   :  { %390 = vmatpush3.bf16.msra.mxu1 %v441_v1  ;;  %v429_v6 = vpack.c.bf16 %v35_v5, %v34_v4  ;;  %v32_v7 = vld [vmem:[%s563_s0] sm:$0xff]  ;;  %v444_v8 = vld [vmem:[#allocation3 + $0x18] sm:$0xff]   ;;  %v33_v9 = vld [vmem:[%s563_s0 + $0x8] sm:$0xff]  ;;  %v144_v20 = vand.u32 127, %v143_v19  ;;  %vm265_vm5 = vcmask 261120  }
  0x15   :  { %391 = vmatprep.subr.bf16.mxu1 %v484_v0  ;;  %386 = vmatprep.mubr.msk.f32.mxu0 %vm43_vm1, %v32_v7  ;;  %v445_v10 = vld [vmem:[#allocation3 + $0x20] sm:$0xff]   ;;  %v446_v11 = vld [vmem:[#allocation3 + $0x28] sm:$0xff]   ;;  %v447_v12 = vld [vmem:[#allocation3 + $0x30] sm:$0xff]  }
  0x16   :  { %430 = vmatprep.subr.bf16.mxu0 %v429_v6  ;;  %v448_v13 = vld [vmem:[#allocation3 + $0x38] sm:$0xff]   ;;  %v345_v15 = vld [vmem:[%s566_s3] ss:$0 sm:$0xff]  ;;  %vm145_vm2 = vcmp.ge.s32.totalorder %v144_v20, 64  ;;  %vm146_vm3 = vcmp.lt.s32.totalorder %v144_v20, 96  ;;  %s488_s3 = smov 32   ;;  %vm356_vm6 = vmpackc.low %vm265_vm5, %vm265_vm5 }
  0x17   :  { %432 = vmatpush3.bf16.msra.mxu0 %v429_v6  ;;  %vm147_vm4 = vmand %vm145_vm2, %vm146_vm3 }
  0x18   :  { %392 = vmatpush3.bf16.msra.mxu1 %v442_v2  ;;  %409 = vmatprep.subr.bf16.mxu0 %v484_v0  ;;  %v148_v23 = vsel %vm147_vm4, 1.0, %v487_v22  ;;  %v149_v31 = vsel %vm147_vm4, 0.0, %v487_v22 }
  0x19   :  { %393 = vmatprep.subr.bf16.mxu1 %v484_v0 }
  0x1a   :  { %387 = vmatmul.mubr.msk.f32.vlgmr.msra.gmra.mrb[0].mxu0 %vm43_vm1, %v33_v9 }
  0x1b   :  { %410 = vmatpush3.bf16.msra.mxu0 %v441_v1  ;;  %425 = vmatprep.mubr.msk.bf16.mxu0 %vm485_vm0, %v484_v0 }
  0x1c   :  { %394 = vmatpush3.bf16.msra.mxu1 %v443_v3  ;;  %411 = vmatprep.subr.bf16.mxu0 %v484_v0 }
  0x1d   :  { %395 = vmatprep.subr.bf16.mxu1 %v484_v0 }
  0x1f   :  { %412 = vmatpush3.bf16.msra.mxu0 %v442_v2 }
  0x20   :  { %396 = vmatpush3.bf16.msra.mxu1 %v444_v8  ;;  %413 = vmatprep.subr.bf16.mxu0 %v484_v0 }
  0x21   :  { %397 = vmatprep.subr.bf16.mxu1 %v484_v0 }
  0x23   :  { %414 = vmatpush3.bf16.msra.mxu0 %v443_v3 }
  0x24   :  { %398 = vmatpush3.bf16.msra.mxu1 %v445_v10  ;;  %415 = vmatprep.subr.bf16.mxu0 %v484_v0 }
  0x25   :  { %399 = vmatprep.subr.bf16.mxu1 %v484_v0 }
  0x27   :  { %416 = vmatpush3.bf16.msra.mxu0 %v444_v8 }
  0x28   :  { %400 = vmatpush3.bf16.msra.mxu1 %v446_v11  ;;  %417 = vmatprep.subr.bf16.mxu0 %v484_v0 }
  0x29   :  { %401 = vmatprep.subr.bf16.mxu1 %v484_v0 }
  0x2b   :  { %418 = vmatpush3.bf16.msra.mxu0 %v445_v10 }
  0x2c   :  { %402 = vmatpush3.bf16.msra.mxu1 %v447_v12  ;;  %419 = vmatprep.subr.bf16.mxu0 %v484_v0 }
  0x2d   :  { %403 = vmatprep.subr.bf16.mxu1 %v484_v0 }
  0x2f   :  { %420 = vmatpush3.bf16.msra.mxu0 %v446_v11 }
  0x30   :  { %404 = vmatpush3.bf16.msra.mxu1 %v448_v13  ;;  %421 = vmatprep.subr.bf16.mxu0 %v484_v0 }
  0x33   :  { %406 = vmatmul.mubr.bf16.vlgmr.msra.gmra.mrb[0].mxu1 %v486_v14  ;;  %422 = vmatpush3.bf16.msra.mxu0 %v447_v12 }
  0x34   :  { %423 = vmatprep.subr.bf16.mxu0 %v484_v0 }
  0x37   :  { %424 = vmatpush3.bf16.msra.mxu0 %v448_v13 }
  0xed   :  { %v388_v16 = vpop.f32.mrb[0].mxu0 }
  0xee   :  { %v122_v17 = vadd.f32 %v388_v16, %v345_v15  ;;  %v116_v18 = vpop.f32.mrb[1].mxu0 }
  0xef   :  { %v117_v21 = vadd.f32 %v345_v15, %v116_v18 }
 0x106   :  { %v233_v24 = vpop.f32.mrb[0].mxu1 }
 0x107   :  { %v239_v25 = vadd.f32 %v233_v24, %v117_v21  ;;  %v407_v26 = vpop.f32.mrb[1].mxu1 }
 0x108   :  { %v236_v27 = vpop.f32.mrb[2].mxu1 }
 0x109   :  { %v240_v28 = vmul.f32 %v239_v25, %v148_v23  ;;  %v408_v29 = vpop.f32.mrb[3].mxu1 }
 0x10b   :  { %449 = vtanh.f32 %v240_v28 }
 0x115   :  { %v450_v30 = vpop.eup %449 }
 0x116   :  { %v242_v32 = vmul.f32 %v450_v30, %v148_v23 }
 0x118   :  { %v243_v33 = vadd.f32 %v242_v32, %v149_v31 }
 0x11a   :  { %246 = vrot.lane.b32.xlu0 %v243_v33, %s482_s25  ;;  %v244_v36 = vmul.f32 0.0, %v243_v33 }
 0x18c   :  { %v247_v34 = vpop.permute.xlu0 %246 }
 0x18d   :  { %v249_v35 = vmul.f32 %v247_v34, %v243_v33 }
 0x18f   :  { %251 = vrot.lane.b32.xlu0 %v249_v35, %s488_s3 }
 0x201   :  { %v252_v37 = vpop.permute.xlu0 %251 }
 0x202   :  { %v254_v38 = vadd.f32 %v252_v37, %v244_v36 }
 0x204   :  { %451 = vtanh.f32 %v254_v38 }
 0x20e   :  { %v452_v39 = vpop.eup %451 }
 0x20f   :  { %257 = vrot.lane.b32.xlu1 %v452_v39, %s482_s25 }
 0x281   :  { %v258_v40 = vpop.permute.xlu1 %257 }
 0x282   :  { %v260_v41 = vmul.f32 %v258_v40, %v243_v33 }
 0x284   :  { %262 = vrot.lane.b32.xlu1 %v260_v41, %s488_s3 }
 0x2f6   :  { %v263_v42 = vpop.permute.xlu1 %262 }
 0x2f7   :  { %v266_v43 = vsel %vm265_vm5, %v263_v42, 0.0  ;;  %v357_v44 = vpack.c.bf16 %v263_v42, %v263_v42 }
 0x2f8   :  { %267 = vst [vmem:[%s567_s4] sm:$0xff] %v266_v43 }
 0x2f9   :  { %426 = vmatmul.mubr.msk.bf16.vlgmr.msra.gmra.mrb[4].mxu0 %vm356_vm6, %v357_v44 }
 0x3cc   :  { %v305_v45 = vpop.f32.mrb[4].mxu0 }
 0x3cd   :  { %v311_v46 = vadd.f32 %v305_v45, %v122_v17  ;;  %v427_v47 = vpop.f32.mrb[5].mxu0 }
 0x3ce   :  { %v308_v48 = vpop.f32.mrb[6].mxu0 }
 0x3cf   :  { %v312_v49 = vmul.f32 %v311_v46, %v148_v23  ;;  %v428_v50 = vpop.f32.mrb[7].mxu0 }
 0x3d1   :  { %453 = vtanh.f32 %v312_v49 }
 0x3db   :  { %v454_v51 = vpop.eup %453 }
 0x3dc   :  { %v314_v52 = vmul.f32 %v454_v51, %v148_v23 }
 0x3de   :  { %v315_v53 = vadd.f32 %v314_v52, %v149_v31 }
 0x3e0   :  { %318 = vrot.lane.b32.xlu0 %v315_v53, %s482_s25  ;;  %v316_v56 = vmul.f32 %v315_v53, %v254_v38 }
 0x452   :  { %v319_v54 = vpop.permute.xlu0 %318 }
 0x453   :  { %v321_v55 = vmul.f32 %v319_v54, %v315_v53 }
 0x455   :  { %323 = vrot.lane.b32.xlu1 %v321_v55, %s488_s3 }
 0x4c7   :  { %v324_v57 = vpop.permute.xlu1 %323 }
 0x4c8   :  { %v326_v58 = vadd.f32 %v324_v57, %v316_v56 }
 0x4ca   :  { %455 = vtanh.f32 %v326_v58 }
 0x4d4   :  { %v456_v59 = vpop.eup %455 }
 0x4d5   :  { %329 = vrot.lane.b32.xlu0 %v456_v59, %s482_s25 }
 0x547   :  { %v330_v60 = vpop.permute.xlu0 %329 }
 0x548   :  { %v332_v61 = vmul.f32 %v330_v60, %v315_v53 }
 0x54a   :  { %334 = vrot.lane.b32.xlu1 %v332_v61, %s488_s3 }
 0x5bc   :  { %v335_v62 = vpop.permute.xlu1 %334 }
 0x5bd   :  { %v337_v63 = vsel %vm265_vm5, %v335_v62, 0.0 }
 0x5be   :  { %359 = vst [vmem:[%s567_s4 + $0x8] sm:$0xff] %v337_v63 }
 0x5bf   :  { %344 = vsyncpa [#allocation4], 1 }

</bundles_post_ra>
